<compile_context>
chip_gen: v7x
topology: tpu7x:2x2x1
jax: 0.10.0
libtpu: 0.0.40
codegen_flags: <defaults>
</compile_context>

<pallas_src>
import jax
import jax.numpy as jnp
from jax import lax
from jax.experimental import pallas as pl
from jax.experimental.pallas import tpu as pltpu


def _round_up(x: int, m: int) -> int:
    return ((x + m - 1) // m) * m


def _fused_embed_linear_kernel(tok_ref, table_t_ref, w_ref, b_ref, o_ref):
    # tok_ref:     (1, tm)      int32  token ids for this tile (lane-major)
    # table_t_ref: (D, V_pad)   f32    transposed embedding table, VMEM-resident
    # w_ref:       (D, 1)       f32    linear weight as a column, resident
    # b_ref:       (1, 1)       f32    bias, resident
    # o_ref:       (1, tm)      f32    per-token logits (lane-dense)
    tm = tok_ref.shape[1]
    v_pad = table_t_ref.shape[1]

    tok = tok_ref[...]                                           # (1, tm)
    vocab = lax.broadcasted_iota(jnp.int32, (v_pad, tm), 0)      # (V_pad, tm)
    onehot = jnp.where(vocab == jnp.broadcast_to(tok, (v_pad, tm)),
                       jnp.float32(1.0), jnp.float32(0.0))       # (V_pad, tm)

    # Fused gather: emb_t[d, t] = table[tok[t], d]   (one MXU matmul per tile)
    emb_t = jnp.dot(table_t_ref[...], onehot,
                    preferred_element_type=jnp.float32)          # (D, tm)

    # Linear head on VPU + sublane reduce: y[t] = sum_d emb[t, d] * w[d] + b
    y = jnp.sum(emb_t * w_ref[...], axis=0, keepdims=True) + b_ref[...]  # (1, tm)
    o_ref[...] = y.astype(o_ref.dtype)


def epitope_forward(tokens, embed_table, weight, bias, *, tm=512):
    """tokens: [B, S] int32; embed_table: [V, D]; weight: [1, D]; bias: [1]
    -> [B, S, 1] float32 (matches torch nn.Linear(embedding_dim, 1) output)."""
    B, S = tokens.shape
    V, D = embed_table.shape
    M = B * S

    tm = max(128, _round_up(tm, 128))          # lane-aligned row tile
    m_pad = _round_up(M, tm)
    grid = m_pad // tm
    v_pad = _round_up(V, 128)                  # aligned MXU contraction dim

    tok = jnp.pad(tokens.reshape(M).astype(jnp.int32), (0, m_pad - M))
    tok2d = tok.reshape(grid, tm)
    table_t = jnp.pad(embed_table.astype(jnp.float32),
                      ((0, v_pad - V), (0, 0))).T               # (D, V_pad)
    w_col = weight.reshape(D, 1).astype(jnp.float32)
    b = bias.reshape(1, 1).astype(jnp.float32)

    out2d = pl.pallas_call(
        _fused_embed_linear_kernel,
        out_shape=jax.ShapeDtypeStruct((grid, tm), jnp.float32),
        grid_spec=pltpu.PrefetchScalarGridSpec(
            num_scalar_prefetch=0,
            grid=(grid,),
            in_specs=[
                pl.BlockSpec((1, tm), lambda i: (i, 0)),       # token ids tile
                pl.BlockSpec((D, v_pad), lambda i: (0, 0)),    # table^T, resident
                pl.BlockSpec((D, 1), lambda i: (0, 0)),        # weight, resident
                pl.BlockSpec((1, 1), lambda i: (0, 0)),        # bias, resident
            ],
            out_specs=pl.BlockSpec((1, tm), lambda i: (i, 0)),  # lane-dense logits
        ),
        compiler_params=pltpu.CompilerParams(
            dimension_semantics=("parallel",)),
    )(tok2d, table_t, w_col, b)

    return out2d.reshape(m_pad)[:M].reshape(B, S, 1)


class EpitopeModelPallas:
    """JAX/Pallas port of EpitopeModel (finetune_lm=False path)."""

    def __init__(self, embedding_dim: int, vocab_size: int = 33, key=None):
        self.embedding_dim = embedding_dim
        key = jax.random.PRNGKey(0) if key is None else key
        k_emb, k_w, k_b = jax.random.split(key, 3)
        # Deterministic stand-in for the frozen ESM embedder's representations.
        self.embed_table = jax.random.normal(
            k_emb, (vocab_size, embedding_dim), dtype=jnp.float32)
        # nn.Linear(embedding_dim, 1): weight (1, D), bias (1,)
        bound = 1.0 / (embedding_dim ** 0.5)
        self.linear_w = jax.random.uniform(
            k_w, (1, embedding_dim), minval=-bound, maxval=bound,
            dtype=jnp.float32)
        self.linear_b = jax.random.uniform(
            k_b, (1,), minval=-bound, maxval=bound, dtype=jnp.float32)

    def __call__(self, X, *, tm=512):
        # X: [B, S] int32 token ids. Gather + linear head fused in one kernel.
        return epitope_forward(X, self.embed_table, self.linear_w,
                               self.linear_b, tm=tm)


if __name__ == "__main__":
    B, S, D, V = 2, 8, 32, 33
    key = jax.random.PRNGKey(0)
    k_tok, k_model = jax.random.split(key)
    tokens = jax.random.randint(k_tok, (B, S), 0, V, dtype=jnp.int32)

    model = EpitopeModelPallas(embedding_dim=D, vocab_size=V, key=k_model)
    out = jax.block_until_ready(model(tokens))

    # Reference check against plain JAX (same semantics as torch Linear on the
    # gathered embeddings).
    emb = jnp.take(model.embed_table, tokens, axis=0)           # [B, S, D]
    ref = emb @ model.linear_w.T + model.linear_b               # [B, S, 1]
    assert out.shape == (B, S, 1)
    assert jnp.allclose(out, ref, atol=1e-5, rtol=1e-5)
    print("KERNEL_OK")
</pallas_src>

<mosaic_0001>
module attributes {stable_mosaic.version = 11 : i64} {
  func.func @_fused_embed_linear_kernel(%arg0: i32, %arg1: memref<1x512xi32, #tpu.memory_space<vmem>>, %arg2: memref<32x128xf32, #tpu.memory_space<vmem>>, %arg3: memref<32x1xf32, #tpu.memory_space<vmem>>, %arg4: memref<1x1xf32, #tpu.memory_space<vmem>>, %arg5: memref<1x512xf32, #tpu.memory_space<vmem>>) attributes {dimension_semantics = [#tpu.dimension_semantics<parallel>], iteration_bounds = array<i64: 1>, scalar_prefetch = 0 : i64, scratch_operands = 0 : i64, tpu.core_type = #tpu.core_type<tc>, window_params = [{transform_indices = @transform_0, window_bounds = array<i64: 1, 512>}, {pipeline_mode = #tpu.pipeline_mode<synchronous>, transform_indices = @transform_1, window_bounds = array<i64: 32, 128>}, {pipeline_mode = #tpu.pipeline_mode<synchronous>, transform_indices = @transform_2, window_bounds = array<i64: 32, 1>}, {pipeline_mode = #tpu.pipeline_mode<synchronous>, transform_indices = @transform_3, window_bounds = array<i64: 1, 1>}, {transform_indices = @transform_4, window_bounds = array<i64: 1, 512>}]} {
    %c0 = arith.constant 0 : index
    %c0_0 = arith.constant 0 : index
    %0 = vector.load %arg1[%c0, %c0_0] : memref<1x512xi32, #tpu.memory_space<vmem>>, vector<1x512xi32>
    %1 = tpu.iota {dimensions = array<i32: 0>} : vector<128x512xi32>
    %2 = vector.shape_cast %0 : vector<1x512xi32> to vector<1x512xi32>
    %3 = vector.broadcast %2 : vector<1x512xi32> to vector<128x512xi32>
    %4 = arith.cmpi eq, %1, %3 : vector<128x512xi32>
    %cst = arith.constant 1.000000e+00 : f32
    %cst_1 = arith.constant 0.000000e+00 : f32
    %5 = vector.broadcast %cst : f32 to vector<128x512xf32>
    %6 = vector.broadcast %cst_1 : f32 to vector<128x512xf32>
    %7 = arith.select %4, %5, %6 : vector<128x512xi1>, vector<128x512xf32>
    %c0_2 = arith.constant 0 : index
    %c0_3 = arith.constant 0 : index
    %8 = vector.load %arg2[%c0_2, %c0_3] : memref<32x128xf32, #tpu.memory_space<vmem>>, vector<32x128xf32>
    %cst_4 = arith.constant dense<0.000000e+00> : vector<32x512xf32>
    %9 = tpu.matmul %8, %7, %cst_4 {dimension_numbers = #tpu.dot_dimension_numbers<[1], [0], [0], [1], [0, 0, 1, 1], [], []>} : vector<32x128xf32>, vector<128x512xf32>, vector<32x512xf32> -> vector<32x512xf32>
    %c0_5 = arith.constant 0 : index
    %c0_6 = arith.constant 0 : index
    %10 = vector.load %arg3[%c0_5, %c0_6] : memref<32x1xf32, #tpu.memory_space<vmem>>, vector<32x1xf32>
    %11 = vector.broadcast %10 : vector<32x1xf32> to vector<32x512xf32>
    %12 = arith.mulf %9, %11 : vector<32x512xf32>
    %cst_7 = arith.constant dense<0.000000e+00> : vector<512xf32>
    %13 = vector.multi_reduction <add>, %12, %cst_7 [0] : vector<32x512xf32> to vector<512xf32>
    %14 = vector.shape_cast %13 : vector<512xf32> to vector<1x512xf32>
    %c0_8 = arith.constant 0 : index
    %c0_9 = arith.constant 0 : index
    %15 = vector.load %arg4[%c0_8, %c0_9] : memref<1x1xf32, #tpu.memory_space<vmem>>, vector<1x1xf32>
    %16 = vector.broadcast %15 : vector<1x1xf32> to vector<1x512xf32>
    %17 = arith.addf %14, %16 : vector<1x512xf32>
    %c0_10 = arith.constant 0 : index
    %c0_11 = arith.constant 0 : index
    %18 = vector.load %arg5[%c0_10, %c0_11] : memref<1x512xf32, #tpu.memory_space<vmem>>, vector<1x512xf32>
    tpu.vector_store %arg5[%c0_10, %c0_11], %17 {strides = array<i32>} : memref<1x512xf32, #tpu.memory_space<vmem>>, vector<1x512xf32>,
    return
  }
  func.func @transform_0(%arg0: i32) -> (i32, i32) {
    %c0_i32 = arith.constant 0 : i32
    %c0_i32_0 = arith.constant 0 : i32
    return %arg0, %c0_i32 : i32, i32
  }
  func.func @transform_1(%arg0: i32) -> (i32, i32) {
    %c0_i32 = arith.constant 0 : i32
    %c0_i32_0 = arith.constant 0 : i32
    %c0_i32_1 = arith.constant 0 : i32
    return %c0_i32, %c0_i32_0 : i32, i32
  }
  func.func @transform_2(%arg0: i32) -> (i32, i32) {
    %c0_i32 = arith.constant 0 : i32
    %c0_i32_0 = arith.constant 0 : i32
    %c0_i32_1 = arith.constant 0 : i32
    return %c0_i32, %c0_i32_0 : i32, i32
  }
  func.func @transform_3(%arg0: i32) -> (i32, i32) {
    %c0_i32 = arith.constant 0 : i32
    %c0_i32_0 = arith.constant 0 : i32
    %c0_i32_1 = arith.constant 0 : i32
    return %c0_i32, %c0_i32_0 : i32, i32
  }
  func.func @transform_4(%arg0: i32) -> (i32, i32) {
    %c0_i32 = arith.constant 0 : i32
    %c0_i32_0 = arith.constant 0 : i32
    return %arg0, %c0_i32 : i32, i32
  }
}

</mosaic_0001>

<bundles_post_ra>
// kernel: tpu_custom_call.1
= control target key start
LH: loop header
LB: loop body
LE: loop exit
PB: predicated region body
PF: predicated region fallthrough
CT: control target
= control target key end

     0   :  { %s877_s0 = inlined_call_operand.vmem [shape: s32[1,512], index: 0, kind: input, shape index: {}]   ;;  %s878_s1 = inlined_call_operand.vmem [shape: f32[32,128], index: 1, kind: input, shape index: {}]   ;;  %s879_s2 = inlined_call_operand.vmem [shape: f32[32,1], index: 2, kind: input, shape index: {}]   ;;  %s880_s3 = inlined_call_operand.<no memory space> [shape: f32[1,1], index: 3, kind: input, shape index: {}]   ;;  %s881_s4 = inlined_call_operand.hbm [shape: f32[1,512], index: 4, kind: output, shape index: {}]  }
   0x1   :  { %v9_v0 = vstv %s880_s3 }
   0x2   :  { %10 = vst [vmem:[#allocation2] sm:$0x1] %v9_v0 }
   0x3   :  { %v21_v1 = vlaneseq  ;;  %v661_v2 = vmov 0.0   ;;  %v662_v4 = vmov 0   ;;  %v364_v5 = vld [vmem:[%s879_s2] sm:$0xff]  ;;  %v366_v6 = vld [vmem:[%s879_s2 + $0x10] sm:$0xff] }
   0x4   :  { %250 = vmatprep.mubr.f32.mxu0 %v661_v2  ;;  %339 = vmatprep.mubr.f32.mxu1 %v661_v2  ;;  %v20_v7 = vld [vmem:[%s877_s0] sm:$0xf] }
   0x5   :  { %v697_v3 = vshrl.u32 %v21_v1, 7  ;;  %635 = vset.pattern.permute.xlu0 %v662_v4  ;;  %636 = vset.pattern.permute.xlu1 %v662_v4 }
   0x6   :  { %370 = vperm.xlu0 %635, %v364_v5   ;;  %380 = vperm.xlu1 %636, %v366_v6  }
   0x7   :  { %11 = vsyncpa [#allocation4], 0  ;;  %v23_v8 = vadd.s32 8, %v697_v3  ;;  %v44_v9 = vsub.s32 1, %v697_v3  ;;  %v52_v10 = vsub.s32 3, %v697_v3  ;;  %v40_v11 = vsub.s32 0, %v697_v3 }
   0x8   :  { %v365_v12 = vld [vmem:[%s879_s2 + $0x8] sm:$0xff]  ;;  %v367_v13 = vld [vmem:[%s879_s2 + $0x18] sm:$0xff]  ;;  %v48_v14 = vsub.s32 2, %v697_v3  ;;  %v24_v15 = vadd.s32 16, %v697_v3  ;;  %v25_v19 = vadd.s32 24, %v697_v3  ;;  %v26_v22 = vadd.s32 32, %v697_v3 }
   0x9   :  { %v720_v16 = vrot.slane %v20_v7, %v44_v9  ;;  %v722_v17 = vrot.slane %v20_v7, %v52_v10  ;;  %v726_v18 = vrot.slane %v20_v7, %v40_v11  ;;  %v663_v21 = vmov 1.0|1.0   ;;  %v440_v24 = vld [vmem:[#allocation2] sm:$0x1]  ;;  %v183_v36 = vld [vmem:[%s878_s1 + $0x8] sm:$0xff]  ;;  %v184_v37 = vld [vmem:[%s878_s1 + $0x10] sm:$0xff] }
   0xa   :  { %v729_v20 = vrot.slane %v20_v7, %v48_v14  ;;  %375 = vperm.xlu0 %635, %v365_v12   ;;  %385 = vperm.xlu1 %636, %v367_v13   ;;  %v27_v23 = vadd.s32 40, %v697_v3  ;;  %v28_v25 = vadd.s32 48, %v697_v3  ;;  %v29_v26 = vadd.s32 56, %v697_v3  ;;  %v182_v35 = vld [vmem:[%s878_s1] sm:$0xff]  ;;  %v185_v38 = vld [vmem:[%s878_s1 + $0x18] sm:$0xff]  ;;  %s665_s1 = smov [#allocation3]  }
   0xb   :  { %vm55_vm0 = vcmp.eq.s32.totalorder %v697_v3, %v720_v16  ;;  %vm59_vm1 = vcmp.eq.s32.totalorder %v23_v8, %v720_v16  ;;  %vm57_vm2 = vcmp.eq.s32.totalorder %v697_v3, %v722_v17  ;;  %vm61_vm3 = vcmp.eq.s32.totalorder %v23_v8, %v722_v17  ;;  %s494_s6 = sshll.u32 %s665_s1, 4  ;;  %s495_s6 = int_to_ptr.vmem [resolvable:$true] %s494_s6 }
   0xc   :  { %vm566_vm4 = vmpackc.low %vm59_vm1, %vm55_vm0  ;;  %vm54_vm5 = vcmp.eq.s32.totalorder %v697_v3, %v726_v18  ;;  %vm58_vm6 = vcmp.eq.s32.totalorder %v23_v8, %v726_v18  ;;  %vm56_vm7 = vcmp.eq.s32.totalorder %v697_v3, %v729_v20  ;;  %vm60_vm8 = vcmp.eq.s32.totalorder %v23_v8, %v729_v20  ;;  %s637_s7 = scalar_lea.vmem %s495_s6, 64  ;;  %p642_p1 = scmp.lt.s32.totalorder %s495_s6, %s495_s6 }
   0xd   :  { %567 = vmatprep.subr.msk.bf16.mxu0 %vm566_vm4, %v663_v21  ;;  %vm598_vm9 = vmpackc.low %vm61_vm3, %vm57_vm2  ;;  %vm63_vm10 = vcmp.eq.s32.totalorder %v24_v15, %v720_v16  ;;  %vm67_vm11 = vcmp.eq.s32.totalorder %v25_v19, %v720_v16  ;;  %vm65_vm13 = vcmp.eq.s32.totalorder %v24_v15, %v722_v17  ;;  %vm69_vm14 = vcmp.eq.s32.totalorder %v25_v19, %v722_v17  ;;  %p638_p0 = scmp.ne.s32.totalorder %s495_s6, %s637_s7  ;;  %p643_p2 = scmp.lt.s32.totalorder %s637_s7, %s637_s7 }
   0xe   :  { %599 = vmatprep.subr.msk.bf16.mxu1 %vm598_vm9, %v663_v21  ;;  %vm568_vm12 = vmpackc.low %vm58_vm6, %vm54_vm5  ;;  %vm62_vm0 = vcmp.eq.s32.totalorder %v24_v15, %v726_v18  ;;  %vm66_vm1 = vcmp.eq.s32.totalorder %v25_v19, %v726_v18  ;;  %vm64_vm3 = vcmp.eq.s32.totalorder %v24_v15, %v729_v20  ;;  %vm68_vm4 = vcmp.eq.s32.totalorder %v25_v19, %v729_v20 }
   0xf   :  { %569 = vmatpush1.bf16.msk.msra.mxu0 %vm568_vm12, %v663_v21  ;;  %vm600_vm15 = vmpackc.low %vm60_vm8, %vm56_vm7  ;;  %vm71_vm6 = vcmp.eq.s32.totalorder %v26_v22, %v720_v16  ;;  %vm75_vm9 = vcmp.eq.s32.totalorder %v27_v23, %v720_v16  ;;  %vm73_vm8 = vcmp.eq.s32.totalorder %v26_v22, %v722_v17  ;;  %vm70_vm12 = vcmp.eq.s32.totalorder %v26_v22, %v726_v18  ;;  %p644_p3 = por %p643_p2, %p642_p1 }
  0x10   :  { %601 = vmatpush1.bf16.msk.msra.mxu1 %vm600_vm15, %v663_v21  ;;  %vm570_vm2 = vmpackc.low %vm67_vm11, %vm63_vm10  ;;  %vm77_vm10 = vcmp.eq.s32.totalorder %v27_v23, %v722_v17  ;;  %443 = vperm.xlu0 %635, %v440_v24   ;;  %vm72_vm15 = vcmp.eq.s32.totalorder %v26_v22, %v729_v20  ;;  %v30_v27 = vadd.s32 64, %v697_v3  ;;  %v31_v28 = vadd.s32 72, %v697_v3 }
  0x11   :  { %571 = vmatprep.subr.msk.bf16.mxu0 %vm570_vm2, %v663_v21  ;;  %vm602_vm5 = vmpackc.low %vm69_vm14, %vm65_vm13  ;;  %vm74_vm13 = vcmp.eq.s32.totalorder %v27_v23, %v726_v18  ;;  %vm76_vm2 = vcmp.eq.s32.totalorder %v27_v23, %v729_v20  ;;  %v32_v29 = vadd.s32 80, %v697_v3  ;;  %v33_v30 = vadd.s32 88, %v697_v3  ;;  %p645_p4 = pnand %p644_p3, %p638_p0 }
  0x12   :  { %603 = vmatprep.subr.msk.bf16.mxu1 %vm602_vm5, %v663_v21  ;;  %vm572_vm7 = vmpackc.low %vm66_vm1, %vm62_vm0  ;;  %vm79_vm1 = vcmp.eq.s32.totalorder %v28_v25, %v720_v16  ;;  %vm83_vm5 = vcmp.eq.s32.totalorder %v29_v26, %v720_v16  ;;  %v34_v31 = vadd.s32 96, %v697_v3  ;;  %v35_v32 = vadd.s32 104, %v697_v3 }
  0x13   :  { %573 = vmatpush1.bf16.msk.msra.mxu0 %vm572_vm7, %v663_v21  ;;  %vm604_vm11 = vmpackc.low %vm68_vm4, %vm64_vm3  ;;  %vm81_vm4 = vcmp.eq.s32.totalorder %v28_v25, %v722_v17  ;;  %vm78_vm7 = vcmp.eq.s32.totalorder %v28_v25, %v726_v18  ;;  %v36_v33 = vadd.s32 112, %v697_v3  ;;  %v37_v34 = vadd.s32 120, %v697_v3 }
  0x14   :  { %605 = vmatpush1.bf16.msk.msra.mxu1 %vm604_vm11, %v663_v21  ;;  %vm574_vm14 = vmpackc.low %vm75_vm9, %vm71_vm6  ;;  %vm85_vm6 = vcmp.eq.s32.totalorder %v29_v26, %v722_v17  ;;  %vm80_vm11 = vcmp.eq.s32.totalorder %v28_v25, %v729_v20 }
  0x15   :  { %575 = vmatprep.subr.msk.bf16.mxu0 %vm574_vm14, %v663_v21  ;;  %vm606_vm0 = vmpackc.low %vm77_vm10, %vm73_vm8  ;;  %vm82_vm8 = vcmp.eq.s32.totalorder %v29_v26, %v726_v18  ;;  %vm84_vm14 = vcmp.eq.s32.totalorder %v29_v26, %v729_v20 }
  0x16   :  { %607 = vmatprep.subr.msk.bf16.mxu1 %vm606_vm0, %v663_v21  ;;  %vm576_vm3 = vmpackc.low %vm74_vm13, %vm70_vm12  ;;  %vm87_vm13 = vcmp.eq.s32.totalorder %v30_v27, %v720_v16  ;;  %vm91_vm0 = vcmp.eq.s32.totalorder %v31_v28, %v720_v16 }
  0x17   :  { %577 = vmatpush1.bf16.msk.msra.mxu0 %vm576_vm3, %v663_v21  ;;  %vm608_vm9 = vmpackc.low %vm76_vm2, %vm72_vm15  ;;  %vm89_vm2 = vcmp.eq.s32.totalorder %v30_v27, %v722_v17  ;;  %vm86_vm3 = vcmp.eq.s32.totalorder %v30_v27, %v726_v18 }
  0x18   :  { %609 = vmatpush1.bf16.msk.msra.mxu1 %vm608_vm9, %v663_v21  ;;  %vm578_vm10 = vmpackc.low %vm83_vm5, %vm79_vm1  ;;  %vm93_vm1 = vcmp.eq.s32.totalorder %v31_v28, %v722_v17  ;;  %vm88_vm9 = vcmp.eq.s32.totalorder %v30_v27, %v729_v20 }
  0x19   :  { %579 = vmatprep.subr.msk.bf16.mxu0 %vm578_vm10, %v663_v21  ;;  %vm610_vm12 = vmpackc.low %vm85_vm6, %vm81_vm4  ;;  %vm90_vm4 = vcmp.eq.s32.totalorder %v31_v28, %v726_v18  ;;  %vm92_vm10 = vcmp.eq.s32.totalorder %v31_v28, %v729_v20 }
  0x1a   :  { %611 = vmatprep.subr.msk.bf16.mxu1 %vm610_vm12, %v663_v21  ;;  %vm580_vm15 = vmpackc.low %vm82_vm8, %vm78_vm7  ;;  %vm95_vm8 = vcmp.eq.s32.totalorder %v32_v29, %v720_v16  ;;  %vm99_vm12 = vcmp.eq.s32.totalorder %v33_v30, %v720_v16 }
  0x1b   :  { %581 = vmatpush1.bf16.msk.msra.mxu0 %vm580_vm15, %v663_v21  ;;  %vm612_vm5 = vmpackc.low %vm84_vm14, %vm80_vm11  ;;  %vm97_vm14 = vcmp.eq.s32.totalorder %v32_v29, %v722_v17  ;;  %vm94_vm15 = vcmp.eq.s32.totalorder %v32_v29, %v726_v18 }
  0x1c   :  { %613 = vmatpush1.bf16.msk.msra.mxu1 %vm612_vm5, %v663_v21  ;;  %vm582_vm6 = vmpackc.low %vm91_vm0, %vm87_vm13  ;;  %vm101_vm13 = vcmp.eq.s32.totalorder %v33_v30, %v722_v17  ;;  %vm96_vm5 = vcmp.eq.s32.totalorder %v32_v29, %v729_v20 }
  0x1d   :  { %583 = vmatprep.subr.msk.bf16.mxu0 %vm582_vm6, %v663_v21  ;;  %vm614_vm7 = vmpackc.low %vm93_vm1, %vm89_vm2  ;;  %vm98_vm2 = vcmp.eq.s32.totalorder %v33_v30, %v726_v18  ;;  %vm100_vm6 = vcmp.eq.s32.totalorder %v33_v30, %v729_v20 }
  0x1e   :  { %615 = vmatprep.subr.msk.bf16.mxu1 %vm614_vm7, %v663_v21  ;;  %vm584_vm11 = vmpackc.low %vm90_vm4, %vm86_vm3  ;;  %vm103_vm4 = vcmp.eq.s32.totalorder %v34_v31, %v720_v16  ;;  %vm107_vm7 = vcmp.eq.s32.totalorder %v35_v32, %v720_v16 }
  0x1f   :  { %585 = vmatpush1.bf16.msk.msra.mxu0 %vm584_vm11, %v663_v21  ;;  %vm616_vm0 = vmpackc.low %vm92_vm10, %vm88_vm9  ;;  %vm105_vm10 = vcmp.eq.s32.totalorder %v34_v31, %v722_v17  ;;  %vm102_vm11 = vcmp.eq.s32.totalorder %v34_v31, %v726_v18 }
  0x20   :  { %617 = vmatpush1.bf16.msk.msra.mxu1 %vm616_vm0, %v663_v21  ;;  %vm586_vm1 = vmpackc.low %vm99_vm12, %vm95_vm8  ;;  %vm109_vm8 = vcmp.eq.s32.totalorder %v35_v32, %v722_v17  ;;  %vm104_vm0 = vcmp.eq.s32.totalorder %v34_v31, %v729_v20 }
  0x21   :  { %587 = vmatprep.subr.msk.bf16.mxu0 %vm586_vm1, %v663_v21  ;;  %vm618_vm3 = vmpackc.low %vm101_vm13, %vm97_vm14  ;;  %vm106_vm14 = vcmp.eq.s32.totalorder %v35_v32, %v726_v18  ;;  %vm108_vm1 = vcmp.eq.s32.totalorder %v35_v32, %v729_v20 }
  0x22   :  { %619 = vmatprep.subr.msk.bf16.mxu1 %vm618_vm3, %v663_v21  ;;  %vm588_vm9 = vmpackc.low %vm98_vm2, %vm94_vm15  ;;  %vm111_vm2 = vcmp.eq.s32.totalorder %v36_v33, %v720_v16  ;;  %vm115_vm3 = vcmp.eq.s32.totalorder %v37_v34, %v720_v16 }
  0x23   :  { %589 = vmatpush1.bf16.msk.msra.mxu0 %vm588_vm9, %v663_v21  ;;  %vm620_vm12 = vmpackc.low %vm100_vm6, %vm96_vm5  ;;  %vm113_vm6 = vcmp.eq.s32.totalorder %v36_v33, %v722_v17  ;;  %vm117_vm9 = vcmp.eq.s32.totalorder %v37_v34, %v722_v17 }
  0x24   :  { %621 = vmatpush1.bf16.msk.msra.mxu1 %vm620_vm12, %v663_v21  ;;  %vm590_vm13 = vmpackc.low %vm107_vm7, %vm103_vm4  ;;  %vm110_vm7 = vcmp.eq.s32.totalorder %v36_v33, %v726_v18  ;;  %vm114_vm12 = vcmp.eq.s32.totalorder %v37_v34, %v726_v18 }
  0x25   :  { %591 = vmatprep.subr.msk.bf16.mxu0 %vm590_vm13, %v663_v21  ;;  %vm622_vm15 = vmpackc.low %vm109_vm8, %vm105_vm10  ;;  %vm112_vm8 = vcmp.eq.s32.totalorder %v36_v33, %v729_v20  ;;  %vm116_vm13 = vcmp.eq.s32.totalorder %v37_v34, %v729_v20 }
  0x26   :  { %623 = vmatprep.subr.msk.bf16.mxu1 %vm622_vm15, %v663_v21  ;;  %vm592_vm5 = vmpackc.low %vm106_vm14, %vm102_vm11 }
  0x27   :  { %593 = vmatpush1.bf16.msk.msra.mxu0 %vm592_vm5, %v663_v21  ;;  %vm624_vm4 = vmpackc.low %vm108_vm1, %vm104_vm0  ;;  %vm485_vm1 = vcmp.lt.s32.totalorder %v21_v1, 512 }
  0x28   :  { %625 = vmatpush1.bf16.msk.msra.mxu1 %vm624_vm4, %v663_v21  ;;  %vm594_vm10 = vmpackc.low %vm115_vm3, %vm111_vm2 }
  0x29   :  { %595 = vmatprep.subr.msk.bf16.mxu0 %vm594_vm10, %v663_v21  ;;  %vm626_vm11 = vmpackc.low %vm117_vm9, %vm113_vm6 }
  0x2a   :  { %627 = vmatprep.subr.msk.bf16.mxu1 %vm626_vm11, %v663_v21  ;;  %vm596_vm14 = vmpackc.low %vm114_vm12, %vm110_vm7 }
  0x2b   :  { %597 = vmatpush1.bf16.msk.msra.mxu0 %vm596_vm14, %v663_v21  ;;  %vm628_vm0 = vmpackc.low %vm116_vm13, %vm112_vm8 }
  0x2c   :  { %629 = vmatpush1.bf16.msk.msra.mxu1 %vm628_vm0, %v663_v21 }
  0x2e   :  { %251 = vmatmul.mubr.f32.vlgmr.msra.gmra.mrb[0].mxu0 %v182_v35 }
  0x2f   :  { %340 = vmatmul.mubr.f32.vlgmr.msra.gmra.mrb[0].mxu1 %v182_v35  ;;  %256 = vmatprep.mubr.f32.mxu0 %v661_v2 }
  0x30   :  { %345 = vmatprep.mubr.f32.mxu1 %v661_v2 }
  0x32   :  { %257 = vmatmul.mubr.f32.gmra.mrb[2].mxu0 %v183_v36 }
  0x33   :  { %346 = vmatmul.mubr.f32.gmra.mrb[2].mxu1 %v183_v36  ;;  %262 = vmatprep.mubr.f32.mxu0 %v661_v2 }
  0x34   :  { %351 = vmatprep.mubr.f32.mxu1 %v661_v2 }
  0x36   :  { %263 = vmatmul.mubr.f32.gmra.mrb[4].mxu0 %v184_v37 }
  0x37   :  { %352 = vmatmul.mubr.f32.gmra.mrb[4].mxu1 %v184_v37  ;;  %268 = vmatprep.mubr.f32.mxu0 %v661_v2  ;;  %v664_v37 = vmov 1966171168  }
  0x38   :  { %357 = vmatprep.mubr.f32.mxu1 %v661_v2 }
  0x3a   :  { %269 = vmatmul.mubr.f32.gmra.mrb[6].mxu0 %v185_v38 }
  0x3b   :  { %358 = vmatmul.mubr.f32.gmra.mrb[6].mxu1 %v185_v38  ;;  %v461_v38 = vunpack.c.l.s4 %v664_v37 }
  0x85   :  { %v371_v39 = vpop.permute.xlu0 %370  ;;  %v381_v53 = vpop.permute.xlu1 %380 }
  0x89   :  { %v376_v44 = vpop.permute.xlu0 %375  ;;  %v386_v10 = vpop.permute.xlu1 %385 }
 0x101   :  { %v252_v40 = vpop.f32.mrb[0].mxu0 }
 0x102   :  { %v341_v41 = vpop.f32.mrb[0].mxu1  ;;  %v254_v42 = vpop.f32.mrb[1].mxu0  ;;  %v388_v46 = vmul.f32 %v371_v39, %v252_v40 }
 0x103   :  { %v343_v43 = vpop.f32.mrb[1].mxu1  ;;  %v390_v50 = vmul.f32 %v371_v39, %v341_v41  ;;  %v389_v51 = vmul.f32 %v371_v39, %v254_v42  ;;  %v444_v41 = vpop.permute.xlu0 %443 }
 0x104   :  { %v391_v56 = vmul.f32 %v371_v39, %v343_v43 }
 0x105   :  { %v258_v45 = vpop.f32.mrb[2].mxu0 }
 0x106   :  { %v392_v47 = vmul.f32 %v376_v44, %v258_v45  ;;  %v347_v48 = vpop.f32.mrb[2].mxu1  ;;  %v260_v49 = vpop.f32.mrb[3].mxu0 }
 0x107   :  { %v394_v52 = vmul.f32 %v376_v44, %v347_v48  ;;  %v393_v54 = vmul.f32 %v376_v44, %v260_v49  ;;  %v349_v55 = vpop.f32.mrb[3].mxu1  ;;  %v462_v48 = vunpack.c.0.s8 %v461_v38  ;;  %v449_v49 = vrot.slane %v444_v41, %v40_v11 }
 0x108   :  { %v404_v57 = vadd.f32 %v392_v47, %v388_v46  ;;  %v395_v58 = vmul.f32 %v376_v44, %v349_v55 }
 0x109   :  { %v422_v59 = vadd.f32 %v394_v52, %v390_v50  ;;  %v413_v60 = vadd.f32 %v393_v54, %v389_v51  ;;  %v264_v61 = vpop.f32.mrb[4].mxu0 }
 0x10a   :  { %v431_v62 = vadd.f32 %v395_v58, %v391_v56  ;;  %v396_v63 = vmul.f32 %v381_v53, %v264_v61  ;;  %v353_v0 = vpop.f32.mrb[4].mxu1  ;;  %v266_v2 = vpop.f32.mrb[5].mxu0  ;;  %v465_v58 = vsub.s32 %v462_v48, %v697_v3 }
 0x10b   :  { %v398_v4 = vmul.f32 %v381_v53, %v353_v0  ;;  %v397_v5 = vmul.f32 %v381_v53, %v266_v2  ;;  %v355_v6 = vpop.f32.mrb[5].mxu1 }
 0x10c   :  { %v405_v7 = vadd.f32 %v404_v57, %v396_v63  ;;  %v399_v8 = vmul.f32 %v381_v53, %v355_v6 }
 0x10d   :  { %v423_v9 = vadd.f32 %v422_v59, %v398_v4  ;;  %v414_v12 = vadd.f32 %v413_v60, %v397_v5  ;;  %v270_v13 = vpop.f32.mrb[6].mxu0 }
 0x10e   :  { %v432_v14 = vadd.f32 %v431_v62, %v399_v8  ;;  %v400_v15 = vmul.f32 %v386_v10, %v270_v13  ;;  %v359_v16 = vpop.f32.mrb[6].mxu1  ;;  %v272_v17 = vpop.f32.mrb[7].mxu0 }
 0x10f   :  { %v402_v18 = vmul.f32 %v386_v10, %v359_v16  ;;  %v401_v19 = vmul.f32 %v386_v10, %v272_v17  ;;  %v361_v20 = vpop.f32.mrb[7].mxu1 }
 0x110   :  { %v406_v21 = vadd.f32 %v405_v7, %v400_v15  ;;  %v403_v22 = vmul.f32 %v386_v10, %v361_v20 }
 0x111   :  { %v424_v23 = vadd.f32 %v423_v9, %v402_v18  ;;  %v415_v24 = vadd.f32 %v414_v12, %v401_v19 }
 0x112   :  { %v407_v25 = vrot.slane %v406_v21, 4  ;;  %v433_v26 = vadd.f32 %v432_v14, %v403_v22 }
 0x113   :  { %v425_v27 = vrot.slane %v424_v23, 4  ;;  %v416_v28 = vrot.slane %v415_v24, 4 }
 0x114   :  { %v408_v29 = vadd.f32 %v407_v25, %v406_v21  ;;  %v434_v30 = vrot.slane %v433_v26, 4 }
 0x115   :  { %v426_v31 = vadd.f32 %v425_v27, %v424_v23  ;;  %v417_v32 = vadd.f32 %v416_v28, %v415_v24 }
 0x116   :  { %v409_v33 = vrot.slane %v408_v29, 2  ;;  %v435_v34 = vadd.f32 %v434_v30, %v433_v26 }
 0x117   :  { %v427_v35 = vrot.slane %v426_v31, 2  ;;  %v418_v36 = vrot.slane %v417_v32, 2 }
 0x118   :  { %v410_v39 = vadd.f32 %v409_v33, %v408_v29  ;;  %v436_v40 = vrot.slane %v435_v34, 2 }
 0x119   :  { %v428_v42 = vadd.f32 %v427_v35, %v426_v31  ;;  %v419_v43 = vadd.f32 %v418_v36, %v417_v32 }
 0x11a   :  { %v411_v44 = vrot.slane %v410_v39, 1  ;;  %v437_v45 = vadd.f32 %v436_v40, %v435_v34 }
 0x11b   :  { %v429_v46 = vrot.slane %v428_v42, 1  ;;  %v420_v47 = vrot.slane %v419_v43, 1 }
 0x11c   :  { %v412_v50 = vadd.f32 %v411_v44, %v410_v39  ;;  %v438_v51 = vrot.slane %v437_v45, 1 }
 0x11d   :  { %v430_v52 = vadd.f32 %v429_v46, %v428_v42  ;;  %v421_v53 = vadd.f32 %v420_v47, %v419_v43 }
 0x11e   :  { %v450_v54 = vadd.f32 %v449_v49, %v412_v50  ;;  %v439_v55 = vadd.f32 %v438_v51, %v437_v45 }
 0x11f   :  { %v452_v56 = vadd.f32 %v449_v49, %v430_v52  ;;  %v451_v57 = vadd.f32 %v449_v49, %v421_v53 }
 0x120   :  { %v453_v59 = vadd.f32 %v449_v49, %v439_v55 }
 0x121   :  { %v458_v60 = vcombine.low %v450_v54, %v451_v57 }
 0x122   :  { %v459_v61 = vcombine.low %v452_v56, %v453_v59 }
 0x123   :  { %v466_v62 = vrot.slane %v458_v60, %v465_v58 }
 0x124   :  { %v473_v63 = vrot.slane %v459_v61, %v465_v58 }
 0x126   :  { %v474_v0 = vcombine.low %v466_v62, %v473_v63 }
 0x128   :  { %v481_v11 = vrot.slane %v474_v0, %v465_v58 }
 0x12a   :  { %487 = vst.msk [vmem:[#allocation3] sm:$0xf] %vm485_vm1, %v481_v11 }
 0x12b   :  { %648 = shalt.err (!%p645_p4)
}
 0x12c   :  { %s649_s10 = scalar_lea.hbm %s881_s4, 64 }
 0x12d   :  { %p650_p5 = scmp.ne.s32.totalorder %s881_s4, %s649_s10  ;;  %p653_p6 = scmp.lt.u32.totalorder %s649_s10, %s881_s4 }
 0x12f   :  { %p655_p7 = pnand %p653_p6, %p650_p5 }
 0x131   :  { %658 = shalt.err (!%p655_p7)
}
 0x132   :  { %497 = dma.vmem_to_hbm [thread:$0]  %s495_s6, 64, %s881_s4, [#allocation4]  }
 0x133   :  { %659 = dma.done.wait [#allocation4], 64  }
 0x134   :  { %660 = vsyncadd [#allocation4], 4294967232 }
 0x135   :  { %501 = vsyncpa [#allocation4], 1 }

</bundles_post_ra>
